<compile_context>
chip_gen: v7x
topology: tpu7x:2x2x1
jax: 0.10.0
libtpu: 0.0.40
codegen_flags: <defaults>
</compile_context>

<pallas_src>
import functools

import jax
import jax.numpy as jnp
import numpy as np
from jax.experimental import pallas as pl
from jax.experimental.pallas import tpu as pltpu

KSIZE = 7
PAD = 3           # KSIZE // 2
LANE = 128
_VMEM_BLOCK_BUDGET = 24 << 20   # double-buffered block budget (v7x-safe)


# ---------------------------------------------------------------------------
# Pallas kernel: batch-blocked, lane-dense, pipelined matmuls per grid step.
# ---------------------------------------------------------------------------
def _fused_chunker_kernel(x_ref, w_ref, b_ref, o_ref, *, b_blk):
    # x_ref: (Bblk, K, Tblk)  im2col'd input block, time on lanes (compute dtype)
    # w_ref: (E, K)           fused conv7+chunk+1x1 weight, VMEM-resident
    # b_ref: (E, 1)           fused bias, f32
    # o_ref: (Bblk, E, Tblk)  NCL output block, lane-dense unmasked stores
    w = w_ref[...]
    bias = b_ref[...]
    for bi in range(b_blk):   # small static unroll; each iter is one MXU matmul
        acc = jnp.dot(w, x_ref[bi], preferred_element_type=jnp.float32)
        o_ref[bi] = (acc + bias).astype(o_ref.dtype)


# ---------------------------------------------------------------------------
# Block / VMEM selection.
# ---------------------------------------------------------------------------
def _divisors_desc(n, cap=8):
    return [d for d in range(min(n, cap), 0, -1) if n % d == 0]


def _pick_blocks(b, t, k_dim, e_dim, in_itemsize, out_itemsize):
    """VMEM-budget-aware (Bblk, Tblk) selection + scoped-VMEM size estimate."""
    t128 = -(-t // LANE) * LANE
    fixed = 2 * (e_dim * k_dim * in_itemsize + e_dim * 4)   # resident W + bias (x2)
    choice = None
    for b_blk in _divisors_desc(b):
        for tb in (2048, 1024, 512, 256, 128):
            t_blk = min(tb, t128)
            step = 2 * b_blk * t_blk * (k_dim * in_itemsize + e_dim * out_itemsize)
            if step + fixed <= _VMEM_BLOCK_BUDGET:
                choice = (b_blk, t_blk, step + fixed)
                break
        if choice is not None:
            break
    if choice is None:   # pathological (huge E*K): fall back to minimal tiles
        b_blk, t_blk = 1, LANE
        choice = (b_blk, t_blk,
                  2 * t_blk * (k_dim * in_itemsize + e_dim * out_itemsize) + fixed)
    b_blk, t_blk, vmem_need = choice
    # Keep >= 2 "parallel" grid steps when possible (v7x: 2 TensorCores/chip).
    if (b // b_blk) * (-(-t // t_blk)) < 2:
        if b > 1:
            b_blk = max(d for d in _divisors_desc(b) if d <= b // 2)
        elif t128 >= 2 * LANE:
            t_blk = max(LANE, ((t128 // 2) // LANE) * LANE)
    return b_blk, t_blk, vmem_need


# ---------------------------------------------------------------------------
# Parameter fusion (prep time) + im2col (trace time, feeds the kernel).
# ---------------------------------------------------------------------------
def fuse_chunker_params(params, ds_rate, compute_dtype=jnp.bfloat16):
    """Compose conv7(pad=3) -> chunk(ds) -> 1x1 conv into one strided conv.

    Runs ONCE at parameter-prep time (depends only on params, not on x):
      W_eff[e, i*(ds+6)+m] = sum_{c, d+k=m} Wp[e, d*Ce+c] * We[c, i, k]
      b_eff[e]             = bp[e] + sum_{d,c} Wp[e, d*Ce+c] * be[c]
    so that out[b,e,t] = b_eff[e] + sum_{i,m} W_eff[e,i,m] * X[b,i, t*ds+m-3].
    """
    w_embed = jnp.asarray(params["w_embed"], jnp.float32)
    b_embed = jnp.asarray(params["b_embed"], jnp.float32)
    w_proj = jnp.asarray(params["w_proj"], jnp.float32)
    b_proj = jnp.asarray(params["b_proj"], jnp.float32)
    ce, cin, _ = w_embed.shape
    e = w_proj.shape[0]
    m = ds_rate + KSIZE - 1
    wp = w_proj[:, :, 0].reshape(e, ds_rate, ce)               # wp[e, d, c]
    weff = jnp.zeros((e, cin, m), jnp.float32)
    for k in range(KSIZE):
        # contrib[e, i, d] = sum_c wp[e, d, c] * We[c, i, k]; lands at m = d + k
        contrib = jnp.einsum("edc,ci->eid", wp, w_embed[:, :, k])
        weff = weff.at[:, :, k : k + ds_rate].add(contrib)
    beff = b_proj + jnp.einsum("edc,c->e", wp, b_embed)
    return dict(w_eff=weff.reshape(e, cin * m).astype(compute_dtype),
                b_eff=beff.reshape(e, 1).astype(jnp.float32))


def _im2col_chunks(x_ncl, ds_rate, dtype):
    """Lane-dense im2col: xcol[b, i*(ds+6)+m, t] = X[b, i, t*ds + m - 3] (0-pad).

    Cast to the compute dtype first so the single wrapper-side pass writes
    half the bytes on the bf16 path; pad/reshape/transpose/concat fuse into
    one producer for the pallas_call operand.
    """
    b, cin, l = x_ncl.shape
    t = l // ds_rate
    x = x_ncl.astype(dtype)
    # Pad so the padded array covers q = t*ds + m for m in [0, ds+6): front 3,
    # back (ds-3)  ->  length (T+1)*ds, then view as chunks of size ds.
    xp = jnp.pad(x, ((0, 0), (0, 0), (PAD, ds_rate - PAD)))
    xr = xp.reshape(b, cin, t + 1, ds_rate)
    xr = jnp.transpose(xr, (0, 1, 3, 2))                      # (B, Cin, ds, T+1)
    head = xr[:, :, :, :t]                                    # m = d       (own chunk)
    tail = xr[:, :, : KSIZE - 1, 1:]                          # m = ds + r  (next chunk head)
    xcol = jnp.concatenate([head, tail], axis=2)              # (B, Cin, ds+6, T)
    return xcol.reshape(b, cin * (ds_rate + KSIZE - 1), t)


# ---------------------------------------------------------------------------
# Forward.
# ---------------------------------------------------------------------------
def chunker_forward(x_ncl, fused_params, ds_rate, out_dtype=None):
    """x_ncl: (B, in_chans, L) -> (B, embed_dim, L // ds_rate)  (NCL layout)."""
    w_flat = fused_params["w_eff"]            # (E, K) compute dtype
    b_flat = fused_params["b_eff"]            # (E, 1) f32
    b, cin, l = x_ncl.shape
    e, k_dim = w_flat.shape
    assert l % ds_rate == 0, "sequence length must be divisible by ds_rate"
    assert ds_rate >= KSIZE - 1, "fused halo formulation assumes ds_rate >= 6"
    assert k_dim == cin * (ds_rate + KSIZE - 1), "fused params do not match input"
    t = l // ds_rate
    out_dtype = x_ncl.dtype if out_dtype is None else jnp.dtype(out_dtype)
    compute_dtype = w_flat.dtype

    xcol = _im2col_chunks(x_ncl, ds_rate, compute_dtype)      # (B, K, T)

    b_blk, t_blk, vmem_need = _pick_blocks(
        b, t, k_dim, e,
        jnp.dtype(compute_dtype).itemsize, jnp.dtype(out_dtype).itemsize)
    t_pad = -(-t // t_blk) * t_blk
    if t_pad != t:      # keep stores lane-dense/unmasked; padded cols dropped below
        xcol = jnp.pad(xcol, ((0, 0), (0, 0), (0, t_pad - t)))
    grid = (b // b_blk, t_pad // t_blk)
    vmem_limit = int(min(max(vmem_need * 5 // 4 + (2 << 20), 32 << 20), 48 << 20))

    out = pl.pallas_call(
        functools.partial(_fused_chunker_kernel, b_blk=b_blk),
        out_shape=jax.ShapeDtypeStruct((b, e, t_pad), out_dtype),
        grid_spec=pltpu.PrefetchScalarGridSpec(
            num_scalar_prefetch=0,
            grid=grid,
            in_specs=[
                pl.BlockSpec((b_blk, k_dim, t_blk), lambda bi, ti: (bi, 0, ti)),
                pl.BlockSpec((e, k_dim), lambda bi, ti: (0, 0)),   # resident weight
                pl.BlockSpec((e, 1), lambda bi, ti: (0, 0)),       # resident bias
            ],
            out_specs=pl.BlockSpec((b_blk, e, t_blk), lambda bi, ti: (bi, 0, ti)),
        ),
        compiler_params=pltpu.CompilerParams(
            dimension_semantics=("parallel", "parallel"),
            vmem_limit_bytes=vmem_limit,
        ),
    )(xcol, w_flat, b_flat)

    if t_pad != t:
        out = out[:, :, :t]   # padded columns hold bias values; never expose them
    return out


# ---------------------------------------------------------------------------
# Parameter init + pure-JAX reference (mirrors the PyTorch forward literally).
# ---------------------------------------------------------------------------
def init_chunker_params(key, in_chans, embed_dim, ds_rate):
    ce = embed_dim // ds_rate
    k1, k2, k3, k4 = jax.random.split(key, 4)
    # Conv1d weight layouts match PyTorch: (out_ch, in_ch, kernel)
    w_embed = jax.random.normal(k1, (ce, in_chans, KSIZE), jnp.float32) * 0.1
    b_embed = jax.random.normal(k2, (ce,), jnp.float32) * 0.1
    w_proj = jax.random.normal(k3, (embed_dim, ce * ds_rate, 1), jnp.float32) * 0.1
    b_proj = jax.random.normal(k4, (embed_dim,), jnp.float32) * 0.1
    return dict(w_embed=w_embed, b_embed=b_embed, w_proj=w_proj, b_proj=b_proj)


def chunker_reference(x_ncl, params, ds_rate):
    y = jax.lax.conv_general_dilated(
        x_ncl, params["w_embed"], window_strides=(1,), padding=[(PAD, PAD)],
        dimension_numbers=("NCH", "OIH", "NCH"))
    y = y + params["b_embed"][None, :, None]
    b, ce, l = y.shape
    t = l // ds_rate
    z = y.reshape(b, ce, t, ds_rate)
    z = jnp.transpose(z, (0, 3, 1, 2)).reshape(b, ds_rate * ce, t)
    o = jnp.einsum("om,bmt->bot", params["w_proj"][:, :, 0], z)
    return o + params["b_proj"][None, :, None]


if __name__ == "__main__":
    B, in_chans, L = 2, 2, 1664          # T = 104 -> padded to 128 inside the wrapper
    embed_dim, ds_rate = 32, 16

    key = jax.random.PRNGKey(0)
    kx, kp = jax.random.split(key)
    x = jax.random.normal(kx, (B, in_chans, L), jnp.float32)
    params = init_chunker_params(kp, in_chans, embed_dim, ds_rate)
    ref = jax.block_until_ready(chunker_reference(x, params, ds_rate))
    T = L // ds_rate

    # 1) f32 path: matches the reference up to fp32 reassociation.
    fused_f32 = fuse_chunker_params(params, ds_rate, compute_dtype=jnp.float32)
    fwd_f32 = jax.jit(functools.partial(chunker_forward, ds_rate=ds_rate))
    out_f32 = jax.block_until_ready(fwd_f32(x, fused_f32))
    assert out_f32.shape == (B, embed_dim, T), out_f32.shape
    assert np.allclose(np.asarray(out_f32), np.asarray(ref), rtol=1e-4, atol=1e-4)

    # 2) bf16 fast path (default): bf16 xcol/W_eff + bf16 output, f32 MXU accum,
    #    f32 bias add before the downcast.
    fused_bf16 = fuse_chunker_params(params, ds_rate)          # bf16 by default
    fwd_bf16 = jax.jit(functools.partial(
        chunker_forward, ds_rate=ds_rate, out_dtype=jnp.bfloat16))
    out_bf16 = jax.block_until_ready(fwd_bf16(x, fused_bf16))
    assert out_bf16.shape == (B, embed_dim, T), out_bf16.shape
    assert out_bf16.dtype == jnp.bfloat16
    assert np.allclose(np.asarray(out_bf16.astype(jnp.float32)), np.asarray(ref),
                       rtol=3e-2, atol=3e-2)

    print("KERNEL_OK")
</pallas_src>

<mosaic_0001>
module attributes {stable_mosaic.version = 11 : i64} {
  func.func @_fused_chunker_kernel(%arg0: i32, %arg1: i32, %arg2: memref<1x44x128xf32, #tpu.memory_space<vmem>>, %arg3: memref<32x44xf32, #tpu.memory_space<vmem>>, %arg4: memref<32x1xf32, #tpu.memory_space<vmem>>, %arg5: memref<1x32x128xf32, #tpu.memory_space<vmem>>) attributes {dimension_semantics = [#tpu.dimension_semantics<parallel>, #tpu.dimension_semantics<parallel>], iteration_bounds = array<i64: 2, 1>, scalar_prefetch = 0 : i64, scratch_operands = 0 : i64, tpu.core_type = #tpu.core_type<tc>, window_params = [{transform_indices = @transform_0, window_bounds = array<i64: 1, 44, 128>}, {pipeline_mode = #tpu.pipeline_mode<synchronous>, transform_indices = @transform_1, window_bounds = array<i64: 32, 44>}, {pipeline_mode = #tpu.pipeline_mode<synchronous>, transform_indices = @transform_2, window_bounds = array<i64: 32, 1>}, {transform_indices = @transform_3, window_bounds = array<i64: 1, 32, 128>}]} {
    %c0 = arith.constant 0 : index
    %c0_0 = arith.constant 0 : index
    %0 = vector.load %arg3[%c0, %c0_0] : memref<32x44xf32, #tpu.memory_space<vmem>>, vector<32x44xf32>
    %c0_1 = arith.constant 0 : index
    %c0_2 = arith.constant 0 : index
    %1 = vector.load %arg4[%c0_1, %c0_2] : memref<32x1xf32, #tpu.memory_space<vmem>>, vector<32x1xf32>
    %c0_3 = arith.constant 0 : index
    %c0_4 = arith.constant 0 : index
    %c0_5 = arith.constant 0 : index
    %2 = vector.load %arg2[%c0_3, %c0_4, %c0_5] : memref<1x44x128xf32, #tpu.memory_space<vmem>>, vector<1x44x128xf32>
    %3 = vector.shape_cast %2 : vector<1x44x128xf32> to vector<44x128xf32>
    %cst = arith.constant dense<0.000000e+00> : vector<32x128xf32>
    %4 = tpu.matmul %0, %3, %cst {dimension_numbers = #tpu.dot_dimension_numbers<[1], [0], [0], [1], [0, 0, 1, 1], [], []>} : vector<32x44xf32>, vector<44x128xf32>, vector<32x128xf32> -> vector<32x128xf32>
    %5 = vector.broadcast %1 : vector<32x1xf32> to vector<32x128xf32>
    %6 = arith.addf %4, %5 : vector<32x128xf32>
    %c0_6 = arith.constant 0 : index
    %c0_7 = arith.constant 0 : index
    %c0_8 = arith.constant 0 : index
    %7 = vector.load %arg5[%c0_6, %c0_7, %c0_8] : memref<1x32x128xf32, #tpu.memory_space<vmem>>, vector<1x32x128xf32>
    %8 = vector.shape_cast %7 : vector<1x32x128xf32> to vector<32x128xf32>
    %9 = vector.shape_cast %6 : vector<32x128xf32> to vector<1x32x128xf32>
    tpu.vector_store %arg5[%c0_6, %c0_7, %c0_8], %9 {strides = array<i32>} : memref<1x32x128xf32, #tpu.memory_space<vmem>>, vector<1x32x128xf32>,
    return
  }
  func.func @transform_0(%arg0: i32, %arg1: i32) -> (i32, i32, i32) {
    %c0_i32 = arith.constant 0 : i32
    %c0_i32_0 = arith.constant 0 : i32
    return %arg0, %c0_i32, %arg1 : i32, i32, i32
  }
  func.func @transform_1(%arg0: i32, %arg1: i32) -> (i32, i32) {
    %c0_i32 = arith.constant 0 : i32
    %c0_i32_0 = arith.constant 0 : i32
    %c0_i32_1 = arith.constant 0 : i32
    return %c0_i32, %c0_i32_0 : i32, i32
  }
  func.func @transform_2(%arg0: i32, %arg1: i32) -> (i32, i32) {
    %c0_i32 = arith.constant 0 : i32
    %c0_i32_0 = arith.constant 0 : i32
    %c0_i32_1 = arith.constant 0 : i32
    return %c0_i32, %c0_i32_0 : i32, i32
  }
  func.func @transform_3(%arg0: i32, %arg1: i32) -> (i32, i32, i32) {
    %c0_i32 = arith.constant 0 : i32
    %c0_i32_0 = arith.constant 0 : i32
    return %arg0, %c0_i32, %arg1 : i32, i32, i32
  }
}

</mosaic_0001>

<bundles_post_ra>
// kernel: chunker_forward.1
= control target key start
LH: loop header
LB: loop body
LE: loop exit
PB: predicated region body
PF: predicated region fallthrough
CT: control target
= control target key end

     0   :  { %8 = vsyncpa [#allocation3], 0  ;;  %s803_s0 = inlined_call_operand.vmem [shape: f32[2,44,128], index: 0, kind: input, shape index: {}]   ;;  %s804_s1 = inlined_call_operand.vmem [shape: f32[32,44], index: 1, kind: input, shape index: {}]   ;;  %s805_s2 = inlined_call_operand.vmem [shape: f32[32,1], index: 2, kind: input, shape index: {}]   ;;  %s806_s3 = inlined_call_operand.hbm [shape: f32[2,32,128], index: 3, kind: output, shape index: {}]  }
   0x1   :  { %10 = vsyncpa [#allocation3 + $0x1], 0  ;;  %s660_s12 = smov 0   ;;  %s662_s13 = smov 0  }
   0x2   :  { %s664_s14 = smov 0   ;;  %s666_s15 = smov 0  }
   0x3   :  { %s668_s16 = smov 0   ;;  %s670_s17 = smov 0  }
   0x4 LB: > { %s427_s18 = sadd.s32 4294967295, %s633_s17   ;;  %s428_s19 = sadd.s32 4294967294, %s633_s17   ;;  %s633_s17 = sphi %s670_s17, %s16_s17   ;;  %s629_s16 = sphi %s668_s16, %s813_s16   ;;  %s625_s15 = sphi %s666_s15, %s812_s15   ;;  %s621_s14 = sphi %s664_s14, %s811_s14   ;;  %s617_s13 = sphi %s662_s13, %s810_s13   ;;  %s613_s12 = sphi %s660_s12, %s809_s12  }
   0x5   : > { %s28_s20 = sadd.s32 1, %s629_s16  ;;  %s107_s21 = sadd.s32 1, %s621_s14 }
   0x6   : > { %p30_p0 = scmp.ge.s32.totalorder %s28_s20, 2  ;;  %p117_p1 = scmp.ne.s32.totalorder %s621_s14, %s617_s13 }
   0x7   : > { %p118_p2 = scmp.eq.s32.totalorder %s427_s18, 1  ;;  %p123_p3 = scmp.ne.s32.totalorder %s617_s13, %s613_s12 }
   0x8   : > { %s815_s20 = smov (%p30_p0, %s28_s20), 0  ;;  %p124_p5 = scmp.eq.s32.totalorder %s428_s19, 1 }
   0x9   : > { %p700_p4 = por %p118_p2, %p117_p1  ;;  %s102_s23 = ssub.s32 %s629_s16, %s815_s20 }
   0xa   : > { %p431_p6 = scmp.ge.s32.totalorder %s633_s17, 1  ;;  %p105_p7 = scmp.eq.s32.totalorder %s102_s23, 0 }
   0xb   : > { %p707_p8 = por %p124_p5, %p123_p3  ;;  %p159_p9 = scmp.lt.s32.totalorder %s633_s17, 3 }
   0xc   : > { %s713_s25 = scalar_select %p105_p7, %s621_s14, %s107_s21  }
   0xd   : > { %p160_p10 = pnand %p431_p6, %p159_p9 }
   0xe   : > { %p186_p11 = scmp.lt.s32.totalorder (!%p160_p10), %s625_s15, 1  ;;  %v194_v0 = vld [vmem:[%s804_s1] sm:$0xff] (!%p160_p10)  ;;  %vm228_vm0 = vcmask (!%p160_p10), 359424   ;;  %v196_v1 = vld [vmem:[%s804_s1 + $0x10] sm:$0xff] (!%p160_p10)  ;;  %v635_v2 = vmov (!%p160_p10), 0   ;;  %v201_v5 = vld [vmem:[%s805_s2 + $0x18] sm:$0xff] (!%p160_p10) }
   0xf   : > { %163 = sbr.rel (%p160_p10) target bundleno = 272 (0x110), region = 32  ;;  %467 = vmatprep.mubr.msk.f32.mxu0 (!%p160_p10), %vm228_vm0, %v194_v0  ;;  %470 = vmatprep.mubr.msk.f32.mxu1 (!%p160_p10), %vm228_vm0, %v196_v1  ;;  %v200_v3 = vld [vmem:[%s805_s2 + $0x10] sm:$0xff] (!%p160_p10)  ;;  %v198_v4 = vld [vmem:[%s805_s2] sm:$0xff] (!%p160_p10)  ;;  %v199_v6 = vld [vmem:[%s805_s2 + $0x8] sm:$0xff] (!%p160_p10)  ;;  %vm241_vm1 = vcmask (!%p160_p10), 1043456   ;;  %vm636_vm2 = vmmov (!%p160_p10), 1  }
  0x10   : > { %554 = vset.pattern.permute.xlu1 (!%p160_p10), %v635_v2  ;;  %553 = vset.pattern.permute.xlu0 (!%p160_p10), %v635_v2  ;;  %vm482_vm3 = vmpackc.low (!%p160_p10), %vm241_vm1, %vm636_vm2  ;;  %v195_v16 = vld [vmem:[%s804_s1 + $0x8] sm:$0xff] (!%p160_p10)  ;;  %v197_v17 = vld [vmem:[%s804_s1 + $0x18] sm:$0xff] (!%p160_p10)  ;;  %s444_s7 = sshll.u32 (!%p160_p10), %s625_s15, 9  ;;  %s637_s18 = smov (!%p160_p10), [#allocation2]  }
  0x11   : > { %220 = vperm.xlu1 (!%p160_p10), %554, %v200_v3   ;;  %210 = vperm.xlu0 (!%p160_p10), %553, %v198_v4   ;;  %s755_s10 = scalar_lea.hbm (!%p160_p10), %s806_s3, %s444_s7  ;;  %s559_s19 = sshll.u32 (!%p160_p10), %s637_s18, 4  ;;  %s560_s19 = int_to_ptr.vmem [resolvable:$false] %s559_s19 }
  0x12   : > { %s561_s21 = scalar_lea.vmem (!%p160_p10), %s560_s19, 1024 }
  0x15   : > { %225 = vperm.xlu1 (!%p160_p10), %554, %v201_v5   ;;  %215 = vperm.xlu0 (!%p160_p10), %553, %v199_v6  }
  0x16   : > { %s187_s30 = scalar_select %p186_p11, %s625_s15, 1 }
  0x18   : > { %s493_s8 = smul.u32 48, %s187_s30  ;;  %s183_s30 = sand.u32 1, %s617_s13  }
  0x19   : > { %s432_s4 = sshll.u32 %s183_s30, 5  ;;  %s757_s15 = scalar_lea.sflag [#allocation3], %s183_s30 }
  0x1a   : > { %s193_s23 = scalar_lea.vmem %s803_s0, %s493_s8  ;;  %s185_s5 = scalar_lea.vmem [#allocation2], %s432_s4 }
  0x1b   : > { %v202_v7 = vld [vmem:[%s193_s23] sm:$0xff]  ;;  %v203_v8 = vld [vmem:[%s193_s23 + $0x8] sm:$0xff]  ;;  %v204_v9 = vld [vmem:[%s193_s23 + $0x10] sm:$0xff]  ;;  %s349_s6 = sshll.u32 %s185_s5, 4  ;;  %s750_s6 = int_to_ptr.vmem [resolvable:$true] %s349_s6 }
  0x1c   : > { %v473_v10 = vpack.c.bf16 %v203_v8, %v202_v7  ;;  %v205_v11 = vld [vmem:[%s193_s23 + $0x18] sm:$0xff]  ;;  %v206_v13 = vld [vmem:[%s193_s23 + $0x20] sm:$0xff]  ;;  %v207_v14 = vld [vmem:[%s193_s23 + $0x28] sm:$0xf]  ;;  %s555_s11 = scalar_lea.vmem %s750_s6, 512  ;;  %p562_p1 = scmp.lt.s32.totalorder %s750_s6, %s560_s19 }
  0x1d   : > { %v477_v12 = vpack.c.bf16 %v205_v11, %v204_v9  ;;  %v481_v15 = vpack.c.bf16 %v207_v14, %v206_v13  ;;  %p556_p12 = scmp.ne.s32.totalorder %s750_s6, %s555_s11  ;;  %p563_p2 = scmp.lt.s32.totalorder %s561_s21, %s555_s11 }
  0x1e   : > { %474 = vmatprep.subr.bf16.mxu0 %v473_v10  ;;  %487 = vmatprep.subr.bf16.mxu1 %v473_v10 }
  0x1f   : > { %476 = vmatpush3.bf16.msra.mxu0 %v473_v10  ;;  %490 = vmatpush3.bf16.msra.mxu1 %v473_v10  ;;  %p557_p13 = pnand %p556_p12, %p700_p4  ;;  %p564_p3 = por %p563_p2, %p562_p1 }
  0x20   : > { %478 = vmatprep.subr.bf16.mxu0 %v477_v12  ;;  %488 = vmatprep.subr.bf16.mxu1 %v477_v12 }
  0x21   : > { %p558_p0 = pneg %p557_p13 }
  0x23   : > { %480 = vmatpush3.bf16.msra.mxu0 %v477_v12  ;;  %491 = vmatpush3.bf16.msra.mxu1 %v477_v12  ;;  %p565_p5 = pnand %p564_p3, %p558_p0 }
  0x24   : > { %483 = vmatprep.subr.msk.bf16.mxu0 %vm482_vm3, %v481_v15  ;;  %489 = vmatprep.subr.msk.bf16.mxu1 %vm482_vm3, %v481_v15 }
  0x27   : > { %486 = vmatpush3.bf16.msk.msra.mxu0 %vm482_vm3, %v481_v15  ;;  %492 = vmatpush3.bf16.msk.msra.mxu1 %vm482_vm3, %v481_v15 }
  0x2a   : > { %468 = vmatmul.mubr.msk.f32.vlgmr.msra.gmra.mrb[0].mxu0 %vm228_vm0, %v195_v16  ;;  %471 = vmatmul.mubr.msk.f32.vlgmr.msra.gmra.mrb[0].mxu1 %vm228_vm0, %v197_v17 }
  0x90   : > { %v221_v18 = vpop.permute.xlu1 %220  ;;  %v211_v19 = vpop.permute.xlu0 %210 }
  0x94   : > { %v226_v20 = vpop.permute.xlu1 %225  ;;  %v216_v21 = vpop.permute.xlu0 %215 }
  0xfd   : > { %v469_v22 = vpop.f32.mrb[0].mxu0  ;;  %v472_v23 = vpop.f32.mrb[0].mxu1 }
  0xfe   : > { %v317_v24 = vadd.f32 %v469_v22, %v216_v21  ;;  %v327_v25 = vadd.f32 %v472_v23, %v226_v20  ;;  %v311_v26 = vpop.f32.mrb[1].mxu0  ;;  %v321_v27 = vpop.f32.mrb[1].mxu1 }
  0xff   : > { %v312_v28 = vadd.f32 %v311_v26, %v211_v19  ;;  %v322_v29 = vadd.f32 %v321_v27, %v221_v18 }
 0x100   : > { %331 = vst [vmem:[%s185_s5 + $0x8] sm:$0xff] %v317_v24  ;;  %333 = vst [vmem:[%s185_s5 + $0x18] sm:$0xff] %v327_v25 }
 0x101   : > { %330 = vst [vmem:[%s185_s5] sm:$0xff] %v312_v28  ;;  %332 = vst [vmem:[%s185_s5 + $0x10] sm:$0xff] %v322_v29 }
 0x102   : > { %568 = shalt.err (!%p565_p5)
}
 0x103   : > { %s569_s23 = scalar_lea.hbm %s755_s10, 512  ;;  %s573_s28 = scalar_lea.hbm %s806_s3, 1024 }
 0x104   : > { %p570_p6 = scmp.ne.s32.totalorder %s755_s10, %s569_s23  ;;  %p574_p10 = scmp.lt.u32.totalorder %s755_s10, %s806_s3 }
 0x105   : > { %p575_p11 = scmp.lt.u32.totalorder %s573_s28, %s569_s23  ;;  %p577_p13 = scmp.lt.u32.totalorder %s569_s23, %s755_s10 }
 0x106   : > { %p571_p7 = pnand %p570_p6, %p700_p4 }
 0x107   : > { %p576_p12 = por %p575_p11, %p574_p10 }
 0x108   : > { %p572_p9 = pneg %p571_p7 }
 0x109   : > { %p578_p0 = por %p577_p13, %p576_p12 }
 0x10b   : > { %p579_p1 = pnand %p578_p0, %p572_p9 }
 0x10d   : > { %582 = shalt.err (!%p579_p1)
}
 0x10e   : > { %s638_s4 = smov 128   ;;  %s639_s5 = smov 8  }
 0x10f   : > { %494 = dma.vmem_to_hbm [thread:$0]  (%p700_p4), %s750_s6, 512, %s755_s10, %s757_s15, %s638_s4, %s638_s4, %s639_s5  }
 0x110 PF: > { %p500_p2 = scmp.ge.s32.totalorder %s633_s17, 2  ;;  %s364_s7 = sand.u32 1, %s613_s12  }
 0x111   : > { %s365_s8 = scalar_lea.sflag [#allocation3], %s364_s7 }
 0x112   : > { %p497_p3 = pnand %p500_p2, %p707_p8 }
 0x114   : > { %608 = dma.done.wait (!%p497_p3), %s365_s8, 512  }
 0x115   : > { %610 = vsyncadd (!%p497_p3), %s365_s8, 4294966784  ;;  %s16_s17 = sadd.s32 1, %s633_s17   ;;  %s809_s12 = smov %s617_s13 }
 0x116   : > { %p13_p5 = scmp.ge.s32.totalorder %s16_s17, 4   ;;  %s810_s13 = smov %s621_s14 }
 0x117   : > { %s811_s14 = smov %s713_s25  ;;  %s812_s15 = smov %s629_s16 }
 0x118   : > { %s813_s16 = smov %s815_s20  ;;  %15 = sbr.rel (!%p13_p5) target bundleno = 4 (0x4), region = 67 }
 0x11f   :  { %370 = vsyncpa [#allocation3], 1 }
 0x120   :  { %372 = vsyncpa [#allocation3 + $0x1], 1 }

</bundles_post_ra>
